<compile_context>
chip_gen: v7x
topology: tpu7x:2x2x1
jax: 0.10.0
libtpu: 0.0.40
codegen_flags: <defaults>
</compile_context>

<pallas_src>
import math

import jax
import jax.numpy as jnp
import numpy as np
from jax.experimental import pallas as pl
from jax.experimental.pallas import tpu as pltpu

DIM = 2
NCOORD = DIM + 1  # 3 embedding coordinates of S^2
LANE = 128


# ----------------------------- Pallas kernel ------------------------------ #
def _make_kernel(ordering):
    # Static channel indices (permutation folded into the kernel).
    c3, c1, c2 = (int(ordering[0]), int(ordering[1]), int(ordering[2]))

    def kernel(params_ref, x_ref, y_ref, ldj_ref):
        # params (SMEM, f32[10]):
        #   [alpha, beta, wa, ba, wb, bb, cos_theta0, sin_theta0, eps, log_alpha]
        alpha = params_ref[0]
        beta = params_ref[1]
        wa = params_ref[2]
        ba = params_ref[3]
        wb = params_ref[4]
        bb = params_ref[5]
        ct0 = params_ref[6]
        st0 = params_ref[7]
        eps = params_ref[8]
        log_alpha = params_ref[9]

        x3 = x_ref[c3]  # (TM, 128) -- full sublane/lane-dense tiles
        x1 = x_ref[c1]
        x2 = x_ref[c2]

        # --- as_angle(x1,x2): implicit via unit (cos phi, sin phi) ----------
        # clamp keeps the pole case (x1=x2=0) finite.
        r2 = jnp.maximum(x1 * x1 + x2 * x2, 1e-30)
        inv_r12 = jax.lax.rsqrt(r2)
        cphi = x1 * inv_r12
        sphi = x2 * inv_r12

        # --- interval_transform(None)(x3): logit-affine-sigmoid on [-1,1] ---
        u = 0.5 * (x3 + 1.0)
        one_m_u = 1.0 - u
        t = alpha * jnp.log(u / one_m_u) + beta
        y3 = jnp.tanh(0.5 * t)                           # == 2*sigmoid(t) - 1
        abs_t = jnp.abs(t)
        # log dydx_3 = log(alpha) + log(s(1-s)) - log(u(1-u)), computed in
        # log-space so saturation of the sigmoid is never amplified.
        log_dydx3 = (log_alpha
                     - (abs_t + 2.0 * jnp.log(1.0 + jnp.exp(-abs_t)))
                     - jnp.log(u * one_m_u))

        # --- circular_transform(y3)(phi12): Moebius on S^1 + fixed rotation -
        a = 0.4 * jnp.tanh(wa * y3 + ba)                 # |omega| <= ~0.566 < 1
        b = 0.4 * jnp.tanh(wb * y3 + bb)
        nr = cphi - a
        ni = sphi - b
        dr = 1.0 - (a * cphi + b * sphi)
        di = -(a * sphi - b * cphi)
        inv_denom = 1.0 / (nr * nr + ni * ni)            # 1 / |z - omega|^2
        cpsi0 = (nr * dr + ni * di) * inv_denom
        spsi0 = (ni * dr - nr * di) * inv_denom
        # fixed rotation by theta0 (does not affect the derivative)
        cpsi = cpsi0 * ct0 - spsi0 * st0
        spsi = spsi0 * ct0 + cpsi0 * st0
        log_dydx12 = jnp.log((1.0 - (a * a + b * b)) * inv_denom)

        # --- as_vector(psi) + safe-masked lift back onto S^2 ----------------
        r3 = jnp.sqrt(jnp.maximum(1.0 - y3 * y3, eps * eps))

        y_ref[c3] = y3
        y_ref[c1] = cpsi * r3
        y_ref[c2] = spsi * r3
        ldj_ref[...] = log_dydx3 + log_dydx12

    return kernel


def _pick_block_rows(rows, max_rows=512):
    """Largest multiple-of-8 divisor of `rows` <= cap; keeps >=2 grid steps."""
    if rows <= 8:
        return rows
    cap = max(8, min(max_rows, rows // 2)) if rows >= 16 else rows
    best = None
    for br in range(8, cap + 1, 8):
        if rows % br == 0:
            best = br
    return best if best is not None else rows


# ------------------------------ wrapper ------------------------------------ #
def recursive_flow_s2(x, params, ordering, block_rows=None):
    """x: (N, 3) float32 points on S^2 -> (y: (N, 3), ldj: (N,))."""
    n = x.shape[0]
    assert n % LANE == 0, "batch must be a multiple of 128"
    rows = n // LANE
    if block_rows is None:
        block_rows = _pick_block_rows(rows)
    assert rows % block_rows == 0

    # glue: single channel-major transpose + free reshape (permutation is
    # folded into the kernel's static row indices).
    x_t = x.T.reshape(NCOORD, rows, LANE)

    kernel = _make_kernel(tuple(ordering))

    y_t, ldj_t = pl.pallas_call(
        kernel,
        out_shape=(
            jax.ShapeDtypeStruct((NCOORD, rows, LANE), jnp.float32),
            jax.ShapeDtypeStruct((rows, LANE), jnp.float32),
        ),
        grid=(rows // block_rows,),
        in_specs=[
            pl.BlockSpec(memory_space=pltpu.MemorySpace.SMEM),              # params
            pl.BlockSpec((NCOORD, block_rows, LANE), lambda i: (0, i, 0)),  # x tile
        ],
        out_specs=(
            pl.BlockSpec((NCOORD, block_rows, LANE), lambda i: (0, i, 0)),
            pl.BlockSpec((block_rows, LANE), lambda i: (i, 0)),
        ),
        compiler_params=pltpu.CompilerParams(dimension_semantics=("parallel",)),
    )(params, x_t)

    y = y_t.reshape(NCOORD, n).T   # glue: back to (N, 3)
    ldj = ldj_t.reshape(n)
    return y, ldj


# ------------------------- pure-JAX reference ------------------------------ #
def recursive_flow_s2_ref(x, params, ordering):
    (alpha, beta, wa, ba, wb, bb, ct0, st0, eps, log_alpha) = [
        params[i] for i in range(10)
    ]
    inv_ordering = sorted(range(NCOORD), key=ordering.__getitem__)
    xp = x[:, jnp.asarray(ordering)]
    x3, x1, x2 = xp[:, 0:1], xp[:, 1:2], xp[:, 2:3]

    phi = jnp.arctan2(x2, x1)                      # as_angle
    u = 0.5 * (x3 + 1.0)
    t = alpha * jnp.log(u / (1.0 - u)) + beta
    y3 = jnp.tanh(0.5 * t)                         # == 2*sigmoid(t) - 1
    abs_t = jnp.abs(t)
    log_dydx3 = (log_alpha
                 - (abs_t + 2.0 * jnp.log(1.0 + jnp.exp(-abs_t)))
                 - jnp.log(u * (1.0 - u)))

    a = 0.4 * jnp.tanh(wa * y3 + ba)
    b = 0.4 * jnp.tanh(wb * y3 + bb)
    z = jnp.concatenate([jnp.cos(phi), jnp.sin(phi)], axis=1)   # as_vector round trip
    nr, ni = z[:, 0:1] - a, z[:, 1:2] - b
    dr = 1.0 - (a * z[:, 0:1] + b * z[:, 1:2])
    di = -(a * z[:, 1:2] - b * z[:, 0:1])
    denom = nr * nr + ni * ni
    cpsi0 = (nr * dr + ni * di) / denom
    spsi0 = (ni * dr - nr * di) / denom
    cpsi = cpsi0 * ct0 - spsi0 * st0
    spsi = spsi0 * ct0 + cpsi0 * st0
    dydx_12 = (1.0 - (a * a + b * b)) / denom

    safe = (1.0 - y3 * y3) > eps * eps
    r3 = jnp.sqrt(jnp.where(safe, 1.0 - y3 * y3, eps * eps))
    y12 = jnp.where(safe, jnp.concatenate([cpsi, spsi], 1) * r3,
                    jnp.concatenate([cpsi, spsi], 1) * eps)
    y = jnp.concatenate([y3, y12], axis=1)[:, jnp.asarray(inv_ordering)]
    ldj = (log_dydx3 + jnp.log(dydx_12))[:, 0]
    return y, ldj


# ------------------------------- main --------------------------------------- #
if __name__ == "__main__":
    key = jax.random.PRNGKey(0)
    k_x, k_rot, k_t0, k_int, k_circ = jax.random.split(key, 5)

    # Deterministic "parameters" (shapes per __init__):
    #   nn.Parameter rotation ~ U(0, 2*pi) -- present in the module but unused
    #   by its forward(); kept here for parity.
    rotation_unused = jax.random.uniform(k_rot, (1,), minval=0.0, maxval=2 * math.pi)
    del rotation_unused  # TODO(synk): `self.rotation` is never used in the reference forward.

    theta0 = float(jax.random.uniform(k_t0, (), minval=0.0, maxval=2 * math.pi))
    a_raw, beta = [float(v) for v in 0.2 * jax.random.normal(k_int, (2,))]
    wa, ba, wb, bb = [float(v) for v in 0.5 * jax.random.normal(k_circ, (4,))]
    alpha = math.exp(a_raw)     # positive slope for the interval transform
    epsilon = 1e-3

    params = jnp.array(
        [alpha, beta, wa, ba, wb, bb,
         math.cos(theta0), math.sin(theta0), epsilon, math.log(alpha)],
        dtype=jnp.float32,
    )

    ordering_1idx = [3, 1, 2]                       # valid permutation of {1,2,3}
    ordering = [i - 1 for i in ordering_1idx]

    # Inputs: batch of points on S^2 (multiple of 128; 2 grid steps here).
    n = 2048
    v = jax.random.normal(k_x, (n, NCOORD), dtype=jnp.float32)
    x = v / jnp.linalg.norm(v, axis=1, keepdims=True)

    y, ldj = recursive_flow_s2(x, params, ordering)
    jax.block_until_ready((y, ldj))

    y_ref, ldj_ref = recursive_flow_s2_ref(x, params, ordering)
    np.testing.assert_allclose(np.asarray(y), np.asarray(y_ref), rtol=1e-4, atol=1e-4)
    np.testing.assert_allclose(np.asarray(ldj), np.asarray(ldj_ref), rtol=1e-4, atol=1e-4)
    # outputs stay on the sphere
    np.testing.assert_allclose(np.asarray(jnp.sum(y * y, axis=1)), np.ones(n),
                               rtol=1e-4, atol=1e-4)

    print("KERNEL_OK")
</pallas_src>

<mosaic_0001>
module attributes {stable_mosaic.version = 11 : i64} {
  func.func @kernel(%arg0: i32, %arg1: memref<10xf32, #tpu.memory_space<smem>>, %arg2: memref<3x8x128xf32, #tpu.memory_space<vmem>>, %arg3: memref<3x8x128xf32, #tpu.memory_space<vmem>>, %arg4: memref<8x128xf32, #tpu.memory_space<vmem>>) attributes {dimension_semantics = [#tpu.dimension_semantics<parallel>], iteration_bounds = array<i64: 2>, scalar_prefetch = 0 : i64, scratch_operands = 0 : i64, tpu.core_type = #tpu.core_type<tc>, window_params = [{transform_indices = @transform_0, window_bounds = array<i64: 10>}, {transform_indices = @transform_1, window_bounds = array<i64: 3, 8, 128>}, {transform_indices = @transform_2, window_bounds = array<i64: 3, 8, 128>}, {transform_indices = @transform_3, window_bounds = array<i64: 8, 128>}]} {
    %c0 = arith.constant 0 : index
    %0 = memref.load %arg1[%c0] : memref<10xf32, #tpu.memory_space<smem>>
    %c1 = arith.constant 1 : index
    %1 = memref.load %arg1[%c1] : memref<10xf32, #tpu.memory_space<smem>>
    %c2 = arith.constant 2 : index
    %2 = memref.load %arg1[%c2] : memref<10xf32, #tpu.memory_space<smem>>
    %c3 = arith.constant 3 : index
    %3 = memref.load %arg1[%c3] : memref<10xf32, #tpu.memory_space<smem>>
    %c4 = arith.constant 4 : index
    %4 = memref.load %arg1[%c4] : memref<10xf32, #tpu.memory_space<smem>>
    %c5 = arith.constant 5 : index
    %5 = memref.load %arg1[%c5] : memref<10xf32, #tpu.memory_space<smem>>
    %c6 = arith.constant 6 : index
    %6 = memref.load %arg1[%c6] : memref<10xf32, #tpu.memory_space<smem>>
    %c7 = arith.constant 7 : index
    %7 = memref.load %arg1[%c7] : memref<10xf32, #tpu.memory_space<smem>>
    %c8 = arith.constant 8 : index
    %8 = memref.load %arg1[%c8] : memref<10xf32, #tpu.memory_space<smem>>
    %c9 = arith.constant 9 : index
    %9 = memref.load %arg1[%c9] : memref<10xf32, #tpu.memory_space<smem>>
    %c2_0 = arith.constant 2 : index
    %c0_1 = arith.constant 0 : index
    %c0_2 = arith.constant 0 : index
    %10 = vector.load %arg2[%c2_0, %c0_1, %c0_2] : memref<3x8x128xf32, #tpu.memory_space<vmem>>, vector<1x8x128xf32>
    %11 = vector.shape_cast %10 : vector<1x8x128xf32> to vector<8x128xf32>
    %c0_3 = arith.constant 0 : index
    %c0_4 = arith.constant 0 : index
    %c0_5 = arith.constant 0 : index
    %12 = vector.load %arg2[%c0_3, %c0_4, %c0_5] : memref<3x8x128xf32, #tpu.memory_space<vmem>>, vector<1x8x128xf32>
    %13 = vector.shape_cast %12 : vector<1x8x128xf32> to vector<8x128xf32>
    %c1_6 = arith.constant 1 : index
    %c0_7 = arith.constant 0 : index
    %c0_8 = arith.constant 0 : index
    %14 = vector.load %arg2[%c1_6, %c0_7, %c0_8] : memref<3x8x128xf32, #tpu.memory_space<vmem>>, vector<1x8x128xf32>
    %15 = vector.shape_cast %14 : vector<1x8x128xf32> to vector<8x128xf32>
    %16 = arith.mulf %13, %13 : vector<8x128xf32>
    %17 = arith.mulf %15, %15 : vector<8x128xf32>
    %18 = arith.addf %16, %17 : vector<8x128xf32>
    %cst = arith.constant 1.000000e-30 : f32
    %19 = vector.broadcast %cst : f32 to vector<8x128xf32>
    %20 = arith.maximumf %18, %19 : vector<8x128xf32>
    %21 = math.rsqrt %20 : vector<8x128xf32>
    %22 = arith.mulf %13, %21 : vector<8x128xf32>
    %23 = arith.mulf %15, %21 : vector<8x128xf32>
    %cst_9 = arith.constant 1.000000e+00 : f32
    %24 = vector.broadcast %cst_9 : f32 to vector<8x128xf32>
    %25 = arith.addf %11, %24 : vector<8x128xf32>
    %cst_10 = arith.constant 5.000000e-01 : f32
    %26 = vector.broadcast %cst_10 : f32 to vector<8x128xf32>
    %27 = arith.mulf %26, %25 : vector<8x128xf32>
    %cst_11 = arith.constant 1.000000e+00 : f32
    %28 = vector.broadcast %cst_11 : f32 to vector<8x128xf32>
    %29 = arith.subf %28, %27 : vector<8x128xf32>
    %30 = arith.divf %27, %29 : vector<8x128xf32>
    %31 = math.log %30 : vector<8x128xf32>
    %32 = vector.broadcast %0 : f32 to vector<8x128xf32>
    %33 = arith.mulf %32, %31 : vector<8x128xf32>
    %34 = vector.broadcast %1 : f32 to vector<8x128xf32>
    %35 = arith.addf %33, %34 : vector<8x128xf32>
    %cst_12 = arith.constant 5.000000e-01 : f32
    %36 = vector.broadcast %cst_12 : f32 to vector<8x128xf32>
    %37 = arith.mulf %36, %35 : vector<8x128xf32>
    %38 = math.tanh %37 : vector<8x128xf32>
    %39 = math.absf %35 : vector<8x128xf32>
    %cst_13 = arith.constant 0.000000e+00 : f32
    %40 = vector.broadcast %cst_13 : f32 to vector<8x128xf32>
    %41 = arith.subf %40, %39 : vector<8x128xf32>
    %42 = math.exp %41 : vector<8x128xf32>
    %cst_14 = arith.constant 1.000000e+00 : f32
    %43 = vector.broadcast %cst_14 : f32 to vector<8x128xf32>
    %44 = arith.addf %43, %42 : vector<8x128xf32>
    %45 = math.log %44 : vector<8x128xf32>
    %cst_15 = arith.constant 2.000000e+00 : f32
    %46 = vector.broadcast %cst_15 : f32 to vector<8x128xf32>
    %47 = arith.mulf %46, %45 : vector<8x128xf32>
    %48 = arith.addf %39, %47 : vector<8x128xf32>
    %49 = vector.broadcast %9 : f32 to vector<8x128xf32>
    %50 = arith.subf %49, %48 : vector<8x128xf32>
    %51 = arith.mulf %27, %29 : vector<8x128xf32>
    %52 = math.log %51 : vector<8x128xf32>
    %53 = arith.subf %50, %52 : vector<8x128xf32>
    %54 = vector.broadcast %2 : f32 to vector<8x128xf32>
    %55 = arith.mulf %54, %38 : vector<8x128xf32>
    %56 = vector.broadcast %3 : f32 to vector<8x128xf32>
    %57 = arith.addf %55, %56 : vector<8x128xf32>
    %58 = math.tanh %57 : vector<8x128xf32>
    %cst_16 = arith.constant 4.000000e-01 : f32
    %59 = vector.broadcast %cst_16 : f32 to vector<8x128xf32>
    %60 = arith.mulf %59, %58 : vector<8x128xf32>
    %61 = vector.broadcast %4 : f32 to vector<8x128xf32>
    %62 = arith.mulf %61, %38 : vector<8x128xf32>
    %63 = vector.broadcast %5 : f32 to vector<8x128xf32>
    %64 = arith.addf %62, %63 : vector<8x128xf32>
    %65 = math.tanh %64 : vector<8x128xf32>
    %cst_17 = arith.constant 4.000000e-01 : f32
    %66 = vector.broadcast %cst_17 : f32 to vector<8x128xf32>
    %67 = arith.mulf %66, %65 : vector<8x128xf32>
    %68 = arith.subf %22, %60 : vector<8x128xf32>
    %69 = arith.subf %23, %67 : vector<8x128xf32>
    %70 = arith.mulf %60, %22 : vector<8x128xf32>
    %71 = arith.mulf %67, %23 : vector<8x128xf32>
    %72 = arith.addf %70, %71 : vector<8x128xf32>
    %cst_18 = arith.constant 1.000000e+00 : f32
    %73 = vector.broadcast %cst_18 : f32 to vector<8x128xf32>
    %74 = arith.subf %73, %72 : vector<8x128xf32>
    %75 = arith.mulf %60, %23 : vector<8x128xf32>
    %76 = arith.mulf %67, %22 : vector<8x128xf32>
    %77 = arith.subf %75, %76 : vector<8x128xf32>
    %cst_19 = arith.constant 0.000000e+00 : f32
    %78 = vector.broadcast %cst_19 : f32 to vector<8x128xf32>
    %79 = arith.subf %78, %77 : vector<8x128xf32>
    %80 = arith.mulf %68, %68 : vector<8x128xf32>
    %81 = arith.mulf %69, %69 : vector<8x128xf32>
    %82 = arith.addf %80, %81 : vector<8x128xf32>
    %cst_20 = arith.constant 1.000000e+00 : f32
    %83 = vector.broadcast %cst_20 : f32 to vector<8x128xf32>
    %84 = arith.divf %83, %82 : vector<8x128xf32>
    %85 = arith.mulf %68, %74 : vector<8x128xf32>
    %86 = arith.mulf %69, %79 : vector<8x128xf32>
    %87 = arith.addf %85, %86 : vector<8x128xf32>
    %88 = arith.mulf %87, %84 : vector<8x128xf32>
    %89 = arith.mulf %69, %74 : vector<8x128xf32>
    %90 = arith.mulf %68, %79 : vector<8x128xf32>
    %91 = arith.subf %89, %90 : vector<8x128xf32>
    %92 = arith.mulf %91, %84 : vector<8x128xf32>
    %93 = vector.broadcast %6 : f32 to vector<8x128xf32>
    %94 = arith.mulf %88, %93 : vector<8x128xf32>
    %95 = vector.broadcast %7 : f32 to vector<8x128xf32>
    %96 = arith.mulf %92, %95 : vector<8x128xf32>
    %97 = arith.subf %94, %96 : vector<8x128xf32>
    %98 = vector.broadcast %6 : f32 to vector<8x128xf32>
    %99 = arith.mulf %92, %98 : vector<8x128xf32>
    %100 = vector.broadcast %7 : f32 to vector<8x128xf32>
    %101 = arith.mulf %88, %100 : vector<8x128xf32>
    %102 = arith.addf %99, %101 : vector<8x128xf32>
    %103 = arith.mulf %60, %60 : vector<8x128xf32>
    %104 = arith.mulf %67, %67 : vector<8x128xf32>
    %105 = arith.addf %103, %104 : vector<8x128xf32>
    %cst_21 = arith.constant 1.000000e+00 : f32
    %106 = vector.broadcast %cst_21 : f32 to vector<8x128xf32>
    %107 = arith.subf %106, %105 : vector<8x128xf32>
    %108 = arith.mulf %107, %84 : vector<8x128xf32>
    %109 = math.log %108 : vector<8x128xf32>
    %110 = arith.mulf %38, %38 : vector<8x128xf32>
    %cst_22 = arith.constant 1.000000e+00 : f32
    %111 = vector.broadcast %cst_22 : f32 to vector<8x128xf32>
    %112 = arith.subf %111, %110 : vector<8x128xf32>
    %113 = arith.mulf %8, %8 : f32
    %114 = vector.broadcast %113 : f32 to vector<8x128xf32>
    %115 = arith.maximumf %112, %114 : vector<8x128xf32>
    %116 = math.sqrt %115 : vector<8x128xf32>
    %c2_23 = arith.constant 2 : index
    %c0_24 = arith.constant 0 : index
    %c0_25 = arith.constant 0 : index
    %117 = vector.load %arg3[%c2_23, %c0_24, %c0_25] : memref<3x8x128xf32, #tpu.memory_space<vmem>>, vector<1x8x128xf32>
    %118 = vector.shape_cast %117 : vector<1x8x128xf32> to vector<8x128xf32>
    %119 = vector.shape_cast %38 : vector<8x128xf32> to vector<1x8x128xf32>
    tpu.vector_store %arg3[%c2_23, %c0_24, %c0_25], %119 {strides = array<i32>} : memref<3x8x128xf32, #tpu.memory_space<vmem>>, vector<1x8x128xf32>,
    %120 = arith.mulf %97, %116 : vector<8x128xf32>
    %c0_26 = arith.constant 0 : index
    %c0_27 = arith.constant 0 : index
    %c0_28 = arith.constant 0 : index
    %121 = vector.load %arg3[%c0_26, %c0_27, %c0_28] : memref<3x8x128xf32, #tpu.memory_space<vmem>>, vector<1x8x128xf32>
    %122 = vector.shape_cast %121 : vector<1x8x128xf32> to vector<8x128xf32>
    %123 = vector.shape_cast %120 : vector<8x128xf32> to vector<1x8x128xf32>
    tpu.vector_store %arg3[%c0_26, %c0_27, %c0_28], %123 {strides = array<i32>} : memref<3x8x128xf32, #tpu.memory_space<vmem>>, vector<1x8x128xf32>,
    %124 = arith.mulf %102, %116 : vector<8x128xf32>
    %c1_29 = arith.constant 1 : index
    %c0_30 = arith.constant 0 : index
    %c0_31 = arith.constant 0 : index
    %125 = vector.load %arg3[%c1_29, %c0_30, %c0_31] : memref<3x8x128xf32, #tpu.memory_space<vmem>>, vector<1x8x128xf32>
    %126 = vector.shape_cast %125 : vector<1x8x128xf32> to vector<8x128xf32>
    %127 = vector.shape_cast %124 : vector<8x128xf32> to vector<1x8x128xf32>
    tpu.vector_store %arg3[%c1_29, %c0_30, %c0_31], %127 {strides = array<i32>} : memref<3x8x128xf32, #tpu.memory_space<vmem>>, vector<1x8x128xf32>,
    %128 = arith.addf %53, %109 : vector<8x128xf32>
    %c0_32 = arith.constant 0 : index
    %c0_33 = arith.constant 0 : index
    %129 = vector.load %arg4[%c0_32, %c0_33] : memref<8x128xf32, #tpu.memory_space<vmem>>, vector<8x128xf32>
    tpu.vector_store %arg4[%c0_32, %c0_33], %128 {strides = array<i32>} : memref<8x128xf32, #tpu.memory_space<vmem>>, vector<8x128xf32>,
    return
  }
  func.func @transform_0(%arg0: i32) -> i32 {
    %c0_i32 = arith.constant 0 : i32
    %c0_i32_0 = arith.constant 0 : i32
    return %c0_i32 : i32
  }
  func.func @transform_1(%arg0: i32) -> (i32, i32, i32) {
    %c0_i32 = arith.constant 0 : i32
    %c0_i32_0 = arith.constant 0 : i32
    %c0_i32_1 = arith.constant 0 : i32
    return %c0_i32, %arg0, %c0_i32_0 : i32, i32, i32
  }
  func.func @transform_2(%arg0: i32) -> (i32, i32, i32) {
    %c0_i32 = arith.constant 0 : i32
    %c0_i32_0 = arith.constant 0 : i32
    %c0_i32_1 = arith.constant 0 : i32
    return %c0_i32, %arg0, %c0_i32_0 : i32, i32, i32
  }
  func.func @transform_3(%arg0: i32) -> (i32, i32) {
    %c0_i32 = arith.constant 0 : i32
    %c0_i32_0 = arith.constant 0 : i32
    return %arg0, %c0_i32 : i32, i32
  }
}

</mosaic_0001>

<bundles_post_ra>
// kernel: tpu_custom_call.1
= control target key start
LH: loop header
LB: loop body
LE: loop exit
PB: predicated region body
PF: predicated region fallthrough
CT: control target
= control target key end

     0   :  { %9 = vsyncpa [#allocation5], 0  ;;  %s1027_s0 = inlined_call_operand.hbm [shape: f32[10], index: 0, kind: input, shape index: {}]   ;;  %s1028_s1 = inlined_call_operand.hbm [shape: f32[3,16,128], index: 1, kind: input, shape index: {}]   ;;  %s1029_s2 = inlined_call_operand.hbm [shape: f32[3,16,128], index: 2, kind: output, shape index: {0}]   ;;  %s1030_s3 = inlined_call_operand.hbm [shape: f32[16,128], index: 3, kind: output, shape index: {1}]  }
   0x1   :  { %10 = vsyncpa [#allocation3], 0 }
   0x2   :  { %12 = vsyncpa [#allocation3 + $0x1], 0 }
   0x3   :  { %13 = vsyncpa [#allocation4], 0 }
   0x4   :  { %15 = vsyncpa [#allocation4 + $0x1], 0 }
   0x5   :  { %16 = vsyncpa [#allocation9], 0 }
   0x6   :  { %18 = vsyncpa [#allocation9 + $0x1], 0  ;;  %s777_s12 = smov 0   ;;  %s779_s13 = smov 0  }
   0x7   :  { %s781_s14 = smov 0   ;;  %s783_s15 = smov 0  }
   0x8 LB: > { %s798_s16 = sadd.s32 4294967295, %s745_s15   ;;  %s480_s17 = sadd.s32 4294967294, %s745_s15   ;;  %s745_s15 = sphi %s783_s15, %s1050_s15   ;;  %s741_s14 = sphi %s781_s14, %s1049_s14   ;;  %s737_s13 = sphi %s779_s13, %s1048_s13   ;;  %s733_s12 = sphi %s777_s12, %s1047_s12  }
   0x9   : > { %s802_s18 = sadd.s32 1, %s745_s15   ;;  %s52_s19 = sadd.s32 1, %s741_s14 }
   0xa   : > { %s49_s20 = ssub.s32 %s745_s15, %s802_s18  ;;  %p59_p0 = scmp.ne.s32.totalorder %s741_s14, %s737_s13 }
   0xb   : > { %p50_p1 = scmp.eq.s32.totalorder %s49_s20, 0  ;;  %p60_p2 = scmp.eq.s32.totalorder %s745_s15, 0 }
   0xc   : > { %p65_p3 = scmp.ne.s32.totalorder %s737_s13, %s733_s12  ;;  %p1031_p4 = scmp.eq.s32.totalorder %s798_s16, 0 }
   0xd   : > { %s814_s21 = scalar_select %p50_p1, %s741_s14, %s52_s19  }
   0xe   : > { %p816_p5 = por %p60_p2, %p59_p0  ;;  %p822_p6 = por %p1031_p4, %p65_p3 }
   0xf   : > { %p89_p7 = scmp.eq.s32.totalorder %s798_s16, 1  ;;  %p95_p8 = scmp.eq.s32.totalorder %s480_s17, 1 }
  0x10   : > { %s1035_s23 = scalar_select %p822_p6, 1, 0 }
  0x11   : > { %p481_p9 = scmp.ge.s32.totalorder %s745_s15, 1  ;;  %p128_p10 = scmp.lt.s32.totalorder %s745_s15, 3 }
  0x12   : > { %p829_p11 = por %p89_p7, %p59_p0  ;;  %p833_p12 = por %p95_p8, %p65_p3 }
  0x13   : > { %p837_p13 = pnand %p481_p9, %p128_p10  ;;  %p534_p4 = scmp.lt.s32.totalorder %s745_s15, 2 }
  0x14   : > { %s1036_s24 = scalar_select %p829_p11, 1, 0 }
  0x15   : > { %s1037_s25 = scalar_select %p833_p12, 1, 0 }
  0x16   : > { %p518_p2 = pneg %p837_p13  ;;  %s150_s27 = sand.u32 1, %s741_s14  }
  0x17   : > { %s484_s28 = sshll.u32 %s745_s15, 7  ;;  %p1039_p6 = scmp.eq.s32.totalorder %s798_s16, 0 }
  0x18   : > { %p851_p7 = pnand %p534_p4, %p816_p5  ;;  %s506_s30 = smul.u32 24, %s150_s27 }
  0x19   : > { %p519_p0 = pnand %p518_p2, %p1039_p6  ;;  %s600_s6 = scalar_lea.hbm %s1027_s0, 16 }
  0x1a   : > { %p601_p3 = scmp.ne.s32.totalorder %s1027_s0, %s600_s6  ;;  %p607_p6 = scmp.lt.u32.totalorder %s600_s6, %s1027_s0 }
  0x1b   : > { %p602_p8 = pneg %p519_p0 }
  0x1d   : > { %p603_p9 = pnand %p602_p8, %p601_p3 }
  0x1f   : > { %p604_p10 = pneg %p603_p9 }
  0x21   : > { %p609_p4 = pnand %p607_p6, %p604_p10 }
  0x23   : > { %612 = shalt.err (!%p609_p4)
}
  0x24   : > { %s747_s11 = smov [#allocation2]   ;;  %s870_s4 = scalar_lea.hbm %s1028_s1, %s484_s28 }
  0x25   : > { %521 = dma.hbm_to_smem (!%p519_p0), %s1027_s0, 16, %s747_s11, [#allocation5]  }
  0x26   : > { %s154_s5 = scalar_lea.vmem [#allocation6], %s506_s30  ;;  %s874_s7 = scalar_lea.sflag [#allocation3], %s150_s27 }
  0x27   : > { %s160_s6 = sshll.u32 %s154_s5, 4  ;;  %s613_s8 = scalar_lea.hbm %s870_s4, 384  ;;  %s872_s6 = int_to_ptr.vmem [resolvable:$true] %s160_s6 }
  0x28   : > { %p614_p5 = scmp.ne.s32.totalorder %s870_s4, %s613_s8  ;;  %p615_p2 = pneg %p851_p7 }
  0x29   : > { %s618_s10 = scalar_lea.hbm %s1028_s1, 768  ;;  %p619_p8 = scmp.lt.u32.totalorder %s870_s4, %s1028_s1 }
  0x2a   : > { %p616_p0 = pnand %p615_p2, %p614_p5  ;;  %p620_p9 = scmp.lt.u32.totalorder %s618_s10, %s613_s8 }
  0x2b   : > { %p622_p6 = scmp.lt.u32.totalorder %s613_s8, %s870_s4 }
  0x2c   : > { %p617_p3 = pneg %p616_p0  ;;  %p621_p10 = por %p620_p9, %p619_p8 }
  0x2e   : > { %p623_p4 = por %p622_p6, %p621_p10 }
  0x30   : > { %p624_p1 = pnand %p623_p4, %p617_p3 }
  0x32   : > { %627 = shalt.err (!%p624_p1)
}
  0x33   : > { %s628_s27 = scalar_lea.vmem %s872_s6, 384  ;;  %s748_s30 = smov [#allocation6]  }
  0x34   : > { %p629_p5 = scmp.ne.s32.totalorder %s872_s6, %s628_s27  ;;  %s633_s19 = sshll.u32 %s748_s30, 4  ;;  %s634_s19 = int_to_ptr.vmem [resolvable:$false] %s633_s19 }
  0x35   : > { %s635_s20 = scalar_lea.vmem %s634_s19, 768  ;;  %p636_p11 = scmp.lt.s32.totalorder %s872_s6, %s634_s19 }
  0x36   : > { %p631_p0 = pnand %p629_p5, %p615_p2  ;;  %p637_p8 = scmp.lt.s32.totalorder %s635_s20, %s628_s27 }
  0x38   : > { %p632_p12 = pneg %p631_p0  ;;  %p638_p9 = por %p637_p8, %p636_p11 }
  0x3a   : > { %p639_p10 = pnand %p638_p9, %p632_p12 }
  0x3c   : > { %642 = shalt.err (!%p639_p10)
}
  0x3d   : > { %s749_s22 = smov 256   ;;  %s750_s5 = smov 128  }
  0x3e   : > { %s751_s8 = smov 8   ;;  %172 = sbr.rel (%p837_p13) target bundleno = 210 (0xd2), region = 28 }
  0x3f   : > { %525 = dma.hbm_to_vmem [thread:$0]  (!%p851_p7), %s870_s4, 384, %s872_s6, %s874_s7, %s749_s22, %s750_s5, %s751_s8  }
  0x40   : > { %p1041_p1 = scmp.eq.s32.totalorder (!%p837_p13), %s798_s16, 0 }
  0x45   : > { %716 = dma.done.wait (%p1041_p1), [#allocation5], 16   ;;  %p1042_p2 = pmov %p1041_p1 }
  0x46   : > { %s909_s28 = sand.u32 1, %s737_s13   ;;  %p1043_p11 = scmp.ne.s32.totalorder %s1035_s23, 0 }
  0x47   : > { %718 = vsyncadd (%p1042_p2), [#allocation5], 4294967280  ;;  %s507_s9 = smul.u32 24, %s909_s28  ;;  %s179_s10 = scalar_lea.sflag [#allocation3], %s909_s28 }
  0x49   : > { %s182_s29 = scalar_lea.vmem [#allocation6], %s507_s9 }
  0x4a   : > { %720 = dma.done.wait (%p1043_p11), %s179_s10, 384  }
  0x4b   : > { %722 = vsyncadd (%p1043_p11), %s179_s10, 4294966912 }
  0x4c   : > { %187 = sfence }
  0x4d   : > { %v497_v0 = vld [vmem:[%s182_s29 + $0x10] sm:$0xff]  ;;  %s211_s26 = sld [smem:[#allocation2]]  ;;  %s488_s4 = sld [smem:[#allocation2 + $0x1]]  ;;  %v223_v13 = vld [vmem:[%s182_s29] sm:$0xff]  ;;  %v498_v14 = vld [vmem:[%s182_s29 + $0x8] sm:$0xff] }
  0x4e   : > { %v233_v1 = vadd.f32 1.0, %v497_v0  ;;  %v226_v16 = vmul.f32 %v223_v13, %v223_v13  ;;  %v227_v17 = vmul.f32 %v498_v14, %v498_v14  ;;  %s489_s23 = sld [smem:[#allocation2 + $0x2]]  ;;  %s491_s6 = sld [smem:[#allocation2 + $0x4]] }
  0x4f   : > { %s490_s7 = sld [smem:[#allocation2 + $0x3]]  ;;  %s492_s11 = sld [smem:[#allocation2 + $0x5]] }
  0x50   : > { %v234_v2 = vmul.f32 0.5, %v233_v1  ;;  %v228_v19 = vadd.f32 %v227_v17, %v226_v16  ;;  %s495_s17 = sld [smem:[#allocation2 + $0x8]]  ;;  %s929_s27 = scalar_lea.vmem [#allocation7], %s507_s9 }
  0x51   : > { %s493_s19 = sld [smem:[#allocation2 + $0x6]]  ;;  %s494_s20 = sld [smem:[#allocation2 + $0x7]] }
  0x52   : > { %v235_v3 = vsub.f32 1.0, %v234_v2  ;;  %v229_v21 = vmax.f32 %v228_v19, 1e-30  ;;  %s933_s22 = sld [smem:[#allocation2 + $0x9]]  ;;  %s350_s5 = sshll.u32 %s929_s27, 4  ;;  %s937_s5 = int_to_ptr.vmem [resolvable:$true] %s350_s5 }
  0x53   : > { %v240_v8 = vstv %s211_s26  ;;  %v242_v10 = vstv %s488_s4  ;;  %s502_s8 = sshll.u32 %s798_s16, 7  ;;  %s487_s9 = sshll.u32 %s909_s28, 3 }
  0x54   : > { %576 = vrcp.f32 %v235_v3  ;;  %v919_v4 = vmul.f32 %v235_v3, %v234_v2  ;;  %v261_v22 = vstv %s489_s23  ;;  %v267_v23 = vstv %s491_s6  ;;  %s948_s26 = scalar_lea.hbm %s1029_s2, %s502_s8  ;;  %s333_s4 = scalar_lea.sflag [#allocation4], %s909_s28 }
  0x55   : > { %v263_v26 = vstv %s490_s7  ;;  %v269_v27 = vstv %s492_s11  ;;  %s643_s23 = scalar_lea.vmem %s937_s5, 384  ;;  %p1044_p13 = scmp.ne.s32.totalorder %s1036_s24, 0 }
  0x56   : > { %s313_s30 = smul.f32 %s495_s17, %s495_s17  ;;  %p644_p12 = scmp.ne.s32.totalorder %s937_s5, %s643_s23 }
  0x57   : > { %s752_s6 = smov [#allocation7]  }
  0x58   : > { %v314_v35 = vstv %s313_s30  ;;  %p645_p7 = pnand %p644_p12, %p1044_p13  ;;  %s647_s7 = sshll.u32 %s752_s6, 4  ;;  %s648_s7 = int_to_ptr.vmem [resolvable:$false] %s647_s7 }
  0x59   : > { %s649_s11 = scalar_lea.vmem %s648_s7, 768  ;;  %p650_p6 = scmp.lt.s32.totalorder %s937_s5, %s648_s7 }
  0x5a   : > { %p646_p3 = pneg %p645_p7  ;;  %p651_p4 = scmp.lt.s32.totalorder %s649_s11, %s643_s23 }
  0x5c   : > { %p652_p5 = por %p651_p4, %p650_p6 }
  0x5e   : > { %v577_v5 = vpop.eup %576  ;;  %p653_p0 = pnand %p652_p5, %p646_p3 }
  0x5f   : > { %v237_v6 = vmul.f32 %v577_v5, %v234_v2 }
  0x61   : > { %578 = vlog2.f32 %v237_v6 }
  0x6b   : > { %v579_v7 = vpop.eup %578 }
  0x6c   : > { %v239_v9 = vmul.f32 0.6931472, %v579_v7 }
  0x6e   : > { %v241_v11 = vmul.f32 %v240_v8, %v239_v9  ;;  %v296_v9 = vstv %s493_s19 }
  0x70   : > { %v921_v12 = vadd.f32 %v242_v10, %v241_v11  ;;  %v298_v11 = vstv %s494_s20 }
  0x72   : > { %v244_v15 = vmul.f32 0.5, %v921_v12  ;;  %v246_v18 = vand.u32 2147483647, %v921_v12 }
  0x74   : > { %580 = vtanh.f32 %v244_v15  ;;  %v247_v20 = vsub.f32 0.0, %v246_v18 }
  0x75   : > { %582 = vrsqrt.f32 %v229_v21 }
  0x76   : > { %v248_v24 = vmul.f32 1.442695, %v247_v20 }
  0x78   : > { %584 = vpow2.f32 %v248_v24 }
  0x7e   : > { %v581_v25 = vpop.eup %580 }
  0x7f   : > { %499 = vst [vmem:[%s929_s27 + $0x10] sm:$0xff] %v581_v25  ;;  %v262_v28 = vmul.f32 %v581_v25, %v261_v22  ;;  %v268_v29 = vmul.f32 %v581_v25, %v267_v23  ;;  %v311_v32 = vmul.f32 %v581_v25, %v581_v25  ;;  %v583_v34 = vpop.eup %582 }
  0x80   : > { %v231_v37 = vmul.f32 %v583_v34, %v223_v13  ;;  %v232_v40 = vmul.f32 %v583_v34, %v498_v14 }
  0x81   : > { %v264_v30 = vadd.f32 %v263_v26, %v262_v28  ;;  %v270_v31 = vadd.f32 %v269_v27, %v268_v29  ;;  %v312_v33 = vsub.f32 1.0, %v311_v32  ;;  %v255_v28 = vstv %s933_s22 }
  0x82   : > { %v585_v36 = vpop.eup %584 }
  0x83   : > { %586 = vtanh.f32 %v264_v30  ;;  %v315_v38 = vmax.f32 %v312_v33, %v314_v35  ;;  %v250_v41 = vadd.f32 1.0, %v585_v36 }
  0x84   : > { %588 = vtanh.f32 %v270_v31 }
  0x85   : > { %590 = vrsqrt.f32 %v315_v38  ;;  %vm318_vm0 = vcmp.eq.f32.partialorder %v315_v38, inf  ;;  %vm320_vm1 = vcmp.eq.f32.partialorder %v315_v38, 0.0  ;;  %v321_v14 = vand.u32 2147483648, %v315_v38 }
  0x86   : > { %592 = vlog2.f32 %v250_v41 }
  0x8d   : > { %v587_v39 = vpop.eup %586 }
  0x8e   : > { %v589_v42 = vpop.eup %588  ;;  %v266_v43 = vmul.f32 0.4, %v587_v39 }
  0x8f   : > { %v272_v44 = vmul.f32 0.4, %v589_v42  ;;  %v591_v61 = vpop.eup %590 }
  0x90   : > { %v273_v45 = vsub.f32 %v231_v37, %v266_v43  ;;  %v275_v46 = vmul.f32 %v266_v43, %v231_v37  ;;  %v279_v47 = vmul.f32 %v266_v43, %v232_v40  ;;  %v304_v56 = vmul.f32 %v266_v43, %v266_v43  ;;  %v593_v2 = vpop.eup %592 }
  0x91   : > { %v274_v48 = vsub.f32 %v232_v40, %v272_v44  ;;  %v276_v49 = vmul.f32 %v272_v44, %v232_v40  ;;  %v280_v50 = vmul.f32 %v272_v44, %v231_v37  ;;  %v305_v57 = vmul.f32 %v272_v44, %v272_v44 }
  0x92   : > { %v283_v51 = vmul.f32 %v273_v45, %v273_v45  ;;  %v317_v3 = vmul.f32 %v591_v61, %v315_v38  ;;  %v252_v7 = vmul.f32 0.6931472, %v593_v2 }
  0x93   : > { %v277_v52 = vadd.f32 %v276_v49, %v275_v46  ;;  %v281_v53 = vsub.f32 %v279_v47, %v280_v50  ;;  %v284_v54 = vmul.f32 %v274_v48, %v274_v48  ;;  %v306_v60 = vadd.f32 %v305_v57, %v304_v56 }
  0x94   : > { %v319_v13 = vsel %vm318_vm0, %v315_v38, %v317_v3  ;;  %v253_v17 = vmul.f32 2.0, %v252_v7 }
  0x95   : > { %v285_v55 = vadd.f32 %v284_v54, %v283_v51  ;;  %v278_v58 = vsub.f32 1.0, %v277_v52  ;;  %v282_v59 = vsub.f32 0.0, %v281_v53  ;;  %v307_v8 = vsub.f32 1.0, %v306_v60 }
  0x96   : > { %v322_v23 = vsel %vm320_vm1, %v321_v14, %v319_v13  ;;  %v254_v26 = vadd.f32 %v253_v17, %v246_v18 }
  0x97   : > { %594 = vrcp.f32 %v285_v55  ;;  %v288_v62 = vmul.f32 %v278_v58, %v273_v45  ;;  %v289_v63 = vmul.f32 %v282_v59, %v274_v48  ;;  %v292_v0 = vmul.f32 %v278_v58, %v274_v48 }
  0x98   : > { %v293_v1 = vmul.f32 %v282_v59, %v273_v45  ;;  %596 = vlog2.f32 %v919_v4  ;;  %v256_v31 = vsub.f32 %v255_v28, %v254_v26 }
  0x99   : > { %v290_v5 = vadd.f32 %v289_v63, %v288_v62 }
  0x9a   : > { %v294_v6 = vsub.f32 %v292_v0, %v293_v1 }
  0xa1   : > { %v595_v10 = vpop.eup %594 }
  0xa2   : > { %v291_v15 = vmul.f32 %v595_v10, %v290_v5  ;;  %v295_v16 = vmul.f32 %v595_v10, %v294_v6  ;;  %v308_v4 = vmul.f32 %v595_v10, %v307_v8  ;;  %v597_v27 = vpop.eup %596 }
  0xa3   : > { %v259_v32 = vmul.f32 0.6931472, %v597_v27 }
  0xa4   : > { %v297_v19 = vmul.f32 %v296_v9, %v291_v15  ;;  %v299_v20 = vmul.f32 %v298_v11, %v295_v16  ;;  %v301_v21 = vmul.f32 %v296_v9, %v295_v16  ;;  %v302_v22 = vmul.f32 %v298_v11, %v291_v15 }
  0xa5   : > { %598 = vlog2.f32 %v308_v4 }
  0xa6   : > { %v300_v24 = vsub.f32 %v297_v19, %v299_v20  ;;  %v303_v25 = vadd.f32 %v302_v22, %v301_v21 }
  0xa8   : > { %v325_v29 = vmul.f32 %v322_v23, %v300_v24  ;;  %v327_v30 = vmul.f32 %v322_v23, %v303_v25 }
  0xaa   : > { %326 = vst [vmem:[%s929_s27] sm:$0xff] %v325_v29  ;;  %500 = vst [vmem:[%s929_s27 + $0x8] sm:$0xff] %v327_v30 }
  0xab   : > { %656 = shalt.err (!%p653_p0)
}
  0xac   : > { %s657_s17 = scalar_lea.hbm %s948_s26, 384  ;;  %s661_s19 = scalar_lea.hbm %s1029_s2, 768 }
  0xad   : > { %p658_p8 = scmp.ne.s32.totalorder %s948_s26, %s657_s17  ;;  %p662_p1 = scmp.lt.u32.totalorder %s948_s26, %s1029_s2 }
  0xae   : > { %p663_p2 = scmp.lt.u32.totalorder %s661_s19, %s657_s17  ;;  %p665_p12 = scmp.lt.u32.totalorder %s657_s17, %s948_s26 }
  0xaf   : > { %p659_p9 = pnand %p658_p8, %p1044_p13 }
  0xb0   : > { %p664_p11 = por %p663_p2, %p662_p1 }
  0xb1   : > { %p660_p10 = pneg %p659_p9 }
  0xb2   : > { %p666_p7 = por %p665_p12, %p664_p11 }
  0xb4   : > { %p667_p3 = pnand %p666_p7, %p660_p10 }
  0xb6   : > { %670 = shalt.err (!%p667_p3)
}
  0xb7   : > { %s753_s10 = smov 128   ;;  %s754_s29 = smov 256   ;;  %v260_v12 = vsub.f32 %v256_v31, %v259_v32  ;;  %v599_v18 = vpop.eup %598 }
  0xb8   : > { %s755_s23 = smov 8   ;;  %s210_s6 = scalar_lea.vmem [#allocation8], %s487_s9  ;;  %v310_v33 = vmul.f32 0.6931472, %v599_v18 }
  0xb9   : > { %514 = dma.vmem_to_hbm [thread:$0]  (%p1044_p13), %s937_s5, 384, %s948_s26, %s333_s4, %s753_s10, %s754_s29, %s755_s23  }
  0xba   : > { %s366_s7 = sshll.u32 %s210_s6, 4  ;;  %v330_v34 = vadd.f32 %v310_v33, %v260_v12  ;;  %s985_s27 = scalar_lea.hbm %s1030_s3, %s502_s8  ;;  %s978_s7 = int_to_ptr.vmem [resolvable:$true] %s366_s7 }
  0xbb   : > { %s338_s5 = scalar_lea.sflag [#allocation9], %s909_s28  ;;  %s671_s26 = scalar_lea.vmem %s978_s7, 128 }
  0xbc   : > { %331 = vst [vmem:[%s210_s6] sm:$0xff] %v330_v34  ;;  %p672_p6 = scmp.ne.s32.totalorder %s978_s7, %s671_s26  ;;  %s756_s9 = smov [#allocation8]  }
  0xbd   : > { %s675_s4 = sshll.u32 %s756_s9, 4  ;;  %s676_s4 = int_to_ptr.vmem [resolvable:$false] %s675_s4 }
  0xbe   : > { %p673_p4 = pnand %p672_p6, %p1044_p13  ;;  %s677_s30 = scalar_lea.vmem %s676_s4, 256 }
  0xbf   : > { %p678_p0 = scmp.lt.s32.totalorder %s978_s7, %s676_s4  ;;  %p679_p8 = scmp.lt.s32.totalorder %s677_s30, %s671_s26 }
  0xc0   : > { %p674_p5 = pneg %p673_p4 }
  0xc1   : > { %p680_p9 = por %p679_p8, %p678_p0 }
  0xc3   : > { %p681_p10 = pnand %p680_p9, %p674_p5 }
  0xc5   : > { %684 = shalt.err (!%p681_p10)
}
  0xc6   : > { %s685_s16 = scalar_lea.hbm %s985_s27, 128  ;;  %s689_s19 = scalar_lea.hbm %s1030_s3, 256 }
  0xc7   : > { %p686_p1 = scmp.ne.s32.totalorder %s985_s27, %s685_s16  ;;  %p690_p12 = scmp.lt.u32.totalorder %s985_s27, %s1030_s3 }
  0xc8   : > { %p691_p7 = scmp.lt.u32.totalorder %s689_s19, %s685_s16  ;;  %p693_p6 = scmp.lt.u32.totalorder %s685_s16, %s985_s27 }
  0xc9   : > { %p687_p2 = pnand %p686_p1, %p1044_p13 }
  0xca   : > { %p692_p3 = por %p691_p7, %p690_p12 }
  0xcb   : > { %p688_p11 = pneg %p687_p2 }
  0xcc   : > { %p694_p4 = por %p693_p6, %p692_p3 }
  0xce   : > { %p695_p5 = pnand %p694_p4, %p688_p11 }
  0xd0   : > { %698 = shalt.err (!%p695_p5)
}
  0xd1   : > { %515 = dma.vmem_to_hbm [thread:$0]  (%p1044_p13), %s978_s7, 128, %s985_s27, %s338_s5  }
  0xd2 PF: > { %s378_s10 = sand.u32 1, %s733_s12   ;;  %p1045_p0 = scmp.ne.s32.totalorder %s1037_s25, 0 }
  0xd3   : > { %p1046_p8 = scmp.ge.s32.totalorder %s745_s15, 2  ;;  %s379_s29 = scalar_lea.sflag [#allocation4], %s378_s10 }
  0xd5   : > { %p527_p9 = pnand %p1046_p8, %p1045_p0 }
  0xd7   : > { %724 = dma.done.wait (!%p527_p9), %s379_s29, 384  }
  0xd8   : > { %726 = vsyncadd (!%p527_p9), %s379_s29, 4294966912  ;;  %s388_s23 = scalar_lea.sflag [#allocation9], %s378_s10 }
  0xd9   : > { %728 = dma.done.wait (!%p527_p9), %s388_s23, 128  }
  0xda   : > { %730 = vsyncadd (!%p527_p9), %s388_s23, 4294967168  ;;  %p21_p13 = scmp.ge.s32.totalorder %s802_s18, 4   ;;  %s1047_s12 = smov %s737_s13 }
  0xdb   : > { %s1048_s13 = smov %s741_s14  ;;  %s1049_s14 = smov %s814_s21 }
  0xdc   : > { %s1050_s15 = smov %s802_s18  ;;  %23 = sbr.rel (!%p21_p13) target bundleno = 8 (0x8), region = 99 }
  0xe3   :  { %393 = vsyncpa [#allocation3], 1 }
  0xe4   :  { %395 = vsyncpa [#allocation3 + $0x1], 1 }
  0xe5   :  { %396 = vsyncpa [#allocation4], 1 }
  0xe6   :  { %398 = vsyncpa [#allocation4 + $0x1], 1 }
  0xe7   :  { %399 = vsyncpa [#allocation9], 1 }
  0xe8   :  { %401 = vsyncpa [#allocation9 + $0x1], 1 }
  0xe9   :  { %402 = vsyncpa [#allocation5], 1 }
  0xea   :  { %404 = vsyncpa [#allocation5 + $0x1], 1 }

</bundles_post_ra>
